<compile_context>
chip_gen: v5e
topology: v5e:2x2
jax: 0.10.0
libtpu: 0.0.40
codegen_flags: <defaults>
</compile_context>

<pallas_src>
import numpy as np
import jax
import jax.numpy as jnp
from jax.experimental import pallas as pl
from jax.experimental.pallas import tpu as pltpu


def _round_up(x, m):
    return (x + m - 1) // m * m


# Conservative per-core VMEM budget: fits v7x's 64 MiB/TC with headroom; also valid
# on v5e/v6e (128 MiB).  All buffers are counted with the default 2x pipeline
# buffering (this "accounts for the 2x" instead of overriding pipeline_mode).
_VMEM_BUDGET_BYTES = 44 * 1024 * 1024


def _tabular_embedding_kernel(x_num_ref,            # VMEM (tb, Fn)  f32
                              idx_ref,              # VMEM (tb, Fc)  i32 (offsets pre-added)
                              w_num_ref, b_num_ref,  # VMEM (Fn, Dp)  f32 (resident)
                              emb_ref,              # VMEM (C,  Dp)  f32 (resident stacked table)
                              b_cat_ref,            # VMEM (Fc, Dp)  f32 (resident)
                              out_ref):             # VMEM (tb, (Fn+Fc)*Dp)
    """One batch tile.  Output layout is feature-major: columns [f*Dp, (f+1)*Dp)."""
    tb, n_num = x_num_ref.shape
    n_cat = idx_ref.shape[1]
    total_card, d_pad = emb_ref.shape
    out_dtype = out_ref.dtype

    # ---------------- numeric tokens: per-feature broadcast FMA (VPU) ---------------
    x = x_num_ref[...]                                   # (tb, Fn)
    w = w_num_ref[...]                                   # (Fn, Dp)
    bn = b_num_ref[...]                                  # (Fn, Dp)
    for f in range(n_num):                               # Fn is small & static -> unrolled
        tok = x[:, f:f + 1] * w[f:f + 1, :] + bn[f:f + 1, :]          # (tb, Dp)
        out_ref[:, f * d_pad:(f + 1) * d_pad] = tok.astype(out_dtype)

    # ------- categorical tokens: vectorized one-hot @ table on the MXU (exact) ------
    # Clip guards both out-of-range user indices and garbage rows of a padded tail
    # tile (those output rows are masked on writeback anyway).
    idx = jnp.clip(idx_ref[...], 0, total_card - 1)      # (tb, Fc) i32
    table = emb_ref[...]                                 # (C, Dp)
    bc = b_cat_ref[...]                                  # (Fc, Dp)
    col = jax.lax.broadcasted_iota(jnp.int32, (tb, total_card), 1)
    for f in range(n_cat):                               # Fc is small & static -> unrolled
        onehot = (idx[:, f:f + 1] == col).astype(jnp.float32)          # (tb, C)
        tok = jnp.dot(onehot, table, preferred_element_type=jnp.float32) + bc[f:f + 1, :]
        c0 = (n_num + f) * d_pad
        out_ref[:, c0:c0 + d_pad] = tok.astype(out_dtype)              # fused bias, lane-dense store


def tabular_embedding(x_num, x_cat, w_num, b_num, emb_table, b_cat,
                      cat_cardinalities, *, batch_tile=512, out_dtype=jnp.float32):
    """Launches the Pallas kernel.  emb_table is the stacked (sum(card), d_token) table."""
    B, n_num = x_num.shape
    _, n_cat = x_cat.shape
    d_token = w_num.shape[1]
    total_card = int(sum(cat_cardinalities))
    assert n_num > 0 and n_cat > 0, "this kernel expects both numeric and categorical features"
    assert emb_table.shape[0] == total_card

    f_tot = n_num + n_cat
    d_pad = _round_up(d_token, 128)                      # lane-dense (128-aligned) token width

    # Zero-pad parameter columns to d_pad (padded columns are sliced off at the end;
    # zeros propagate exactly through FMA / one-hot matmul).
    if d_pad != d_token:
        pad = ((0, 0), (0, d_pad - d_token))
        w_num_p = jnp.pad(w_num.astype(jnp.float32), pad)
        b_num_p = jnp.pad(b_num.astype(jnp.float32), pad)
        emb_p = jnp.pad(emb_table.astype(jnp.float32), pad)
        b_cat_p = jnp.pad(b_cat.astype(jnp.float32), pad)
    else:
        w_num_p, b_num_p, emb_p, b_cat_p = (
            a.astype(jnp.float32) for a in (w_num, b_num, emb_table, b_cat))

    # Per-feature offsets folded into the indices HBM-side; fed as a VMEM-tiled input
    # (no whole-batch SMEM scalar prefetch -> scales with B).
    offsets = jnp.asarray(np.cumsum([0] + list(cat_cardinalities))[:-1], jnp.int32)
    idx = x_cat.astype(jnp.int32) + offsets[None, :]
    x_num_f = x_num.astype(jnp.float32)

    # ------------------- VMEM budget -> batch tile (counts 2x buffering) -------------
    resident_bytes = 4 * d_pad * (2 * _round_up(n_num, 8)
                                  + _round_up(total_card, 8) + _round_up(n_cat, 8))

    def vmem_estimate(tb_):
        row_bytes = 4 * (_round_up(n_num, 128) + _round_up(n_cat, 128) + f_tot * d_pad)
        return 2 * (resident_bytes + tb_ * row_bytes)    # everything double-buffered

    tb = min(int(batch_tile), B)
    if tb < B:
        tb = max(8, (tb // 8) * 8)                       # sublane-aligned partial tiles
    while tb > 8 and vmem_estimate(tb) > _VMEM_BUDGET_BYTES:
        tb = max(8, ((tb // 2) // 8) * 8)
    if vmem_estimate(tb) > _VMEM_BUDGET_BYTES:
        # TODO(synk): switch to an HBM-resident table + manual DMA row gather here.
        raise ValueError("stacked embedding table too large to keep VMEM-resident")

    grid = (pl.cdiv(B, tb),)
    vmem_limit = int(min(64 * 1024 * 1024,
                         max(32 * 1024 * 1024, vmem_estimate(tb) + 4 * 1024 * 1024)))

    out2d = pl.pallas_call(
        _tabular_embedding_kernel,
        grid_spec=pl.GridSpec(
            grid=grid,
            in_specs=[
                pl.BlockSpec((tb, n_num), lambda b: (b, 0)),            # x_num tile
                pl.BlockSpec((tb, n_cat), lambda b: (b, 0)),            # offset-adjusted indices tile
                pl.BlockSpec((n_num, d_pad), lambda b: (0, 0)),         # W_num   (VMEM-resident)
                pl.BlockSpec((n_num, d_pad), lambda b: (0, 0)),         # B_num   (VMEM-resident)
                pl.BlockSpec((total_card, d_pad), lambda b: (0, 0)),    # emb tbl (VMEM-resident)
                pl.BlockSpec((n_cat, d_pad), lambda b: (0, 0)),         # B_cat   (VMEM-resident)
            ],
            out_specs=pl.BlockSpec((tb, f_tot * d_pad), lambda b: (b, 0)),
        ),
        out_shape=jax.ShapeDtypeStruct((B, f_tot * d_pad), out_dtype),
        compiler_params=pltpu.CompilerParams(
            dimension_semantics=("parallel",),           # batch tiles shard across TCs (v7x)
            vmem_limit_bytes=vmem_limit,
        ),
    )(x_num_f, idx, w_num_p, b_num_p, emb_p, b_cat_p)

    tokens = out2d.reshape(B, f_tot, d_pad)              # free: row-major reshape
    if d_pad != d_token:
        tokens = tokens[..., :d_token]                   # drop zero padding
    return tokens


def _reference(x_num, x_cat, w_num, b_num, emb_table, b_cat, cat_cardinalities):
    """Pure-JAX reference mirroring the PyTorch module."""
    num_tokens = x_num[:, :, None] * w_num[None, :, :] + b_num[None, :, :]
    offs = np.cumsum([0] + list(cat_cardinalities))[:-1].astype(np.int32)
    flat_idx = x_cat + jnp.asarray(offs)[None, :]
    cat_tokens = emb_table[flat_idx] + b_cat[None, :, :]
    return jnp.concatenate([num_tokens, cat_tokens], axis=1)


if __name__ == "__main__":
    # Shapes consistent with the module's docstring example.
    n_objects = 4
    n_num_features = 3
    cat_cardinalities = [2, 3]
    d_token = 7
    total_card = sum(cat_cardinalities)

    key = jax.random.PRNGKey(0)
    k1, k2, k3, k4, k5, k6, k7, k8 = jax.random.split(key, 8)

    # Deterministic synthetic parameters (shapes per LinearEmbeddings /
    # CategoricalEmbeddings from rtdl_revisiting_models v0.0.2).
    w_num = jax.random.uniform(k1, (n_num_features, d_token), jnp.float32, -0.5, 0.5)
    b_num = jax.random.uniform(k2, (n_num_features, d_token), jnp.float32, -0.5, 0.5)
    emb_table = jax.random.uniform(k3, (total_card, d_token), jnp.float32, -0.5, 0.5)
    b_cat = jax.random.uniform(k4, (len(cat_cardinalities), d_token), jnp.float32, -0.5, 0.5)

    # Inputs.
    x_num = jax.random.normal(k5, (n_objects, n_num_features), jnp.float32)
    x_cat = jnp.array([[0, 1], [1, 0], [0, 2], [1, 1]], dtype=jnp.int32)

    out = tabular_embedding(x_num, x_cat, w_num, b_num, emb_table, b_cat, cat_cardinalities)
    out = jax.block_until_ready(out)
    ref = _reference(x_num, x_cat, w_num, b_num, emb_table, b_cat, cat_cardinalities)
    assert out.shape == (n_objects, n_num_features + len(cat_cardinalities), d_token)
    np.testing.assert_allclose(np.asarray(out), np.asarray(ref), rtol=1e-5, atol=1e-5)

    # Tail-tile check: batch not divisible by the batch tile.
    B2 = 9
    x_num2 = jax.random.normal(k6, (B2, n_num_features), jnp.float32)
    x_cat2 = jnp.concatenate(
        [jax.random.randint(k7, (B2, 1), 0, cat_cardinalities[0]),
         jax.random.randint(k8, (B2, 1), 0, cat_cardinalities[1])], axis=1).astype(jnp.int32)
    out2 = jax.block_until_ready(
        tabular_embedding(x_num2, x_cat2, w_num, b_num, emb_table, b_cat,
                          cat_cardinalities, batch_tile=8))
    ref2 = _reference(x_num2, x_cat2, w_num, b_num, emb_table, b_cat, cat_cardinalities)
    np.testing.assert_allclose(np.asarray(out2), np.asarray(ref2), rtol=1e-5, atol=1e-5)

    print("KERNEL_OK")
</pallas_src>

<mosaic_0001>
module attributes {stable_mosaic.version = 11 : i64} {
  func.func @_tabular_embedding_kernel(%arg0: i32, %arg1: memref<4x3xf32, #tpu.memory_space<vmem>>, %arg2: memref<4x2xi32, #tpu.memory_space<vmem>>, %arg3: memref<3x128xf32, #tpu.memory_space<vmem>>, %arg4: memref<3x128xf32, #tpu.memory_space<vmem>>, %arg5: memref<5x128xf32, #tpu.memory_space<vmem>>, %arg6: memref<2x128xf32, #tpu.memory_space<vmem>>, %arg7: memref<4x640xf32, #tpu.memory_space<vmem>>) attributes {dimension_semantics = [#tpu.dimension_semantics<parallel>], iteration_bounds = array<i64: 1>, scalar_prefetch = 0 : i64, scratch_operands = 0 : i64, tpu.core_type = #tpu.core_type<tc>, window_params = [{transform_indices = @transform_0, window_bounds = array<i64: 4, 3>}, {transform_indices = @transform_1, window_bounds = array<i64: 4, 2>}, {pipeline_mode = #tpu.pipeline_mode<synchronous>, transform_indices = @transform_2, window_bounds = array<i64: 3, 128>}, {pipeline_mode = #tpu.pipeline_mode<synchronous>, transform_indices = @transform_3, window_bounds = array<i64: 3, 128>}, {pipeline_mode = #tpu.pipeline_mode<synchronous>, transform_indices = @transform_4, window_bounds = array<i64: 5, 128>}, {pipeline_mode = #tpu.pipeline_mode<synchronous>, transform_indices = @transform_5, window_bounds = array<i64: 2, 128>}, {transform_indices = @transform_6, window_bounds = array<i64: 4, 640>}]} {
    %c0 = arith.constant 0 : index
    %c0_0 = arith.constant 0 : index
    %0 = vector.load %arg1[%c0, %c0_0] : memref<4x3xf32, #tpu.memory_space<vmem>>, vector<4x3xf32>
    %c0_1 = arith.constant 0 : index
    %c0_2 = arith.constant 0 : index
    %1 = vector.load %arg3[%c0_1, %c0_2] : memref<3x128xf32, #tpu.memory_space<vmem>>, vector<3x128xf32>
    %c0_3 = arith.constant 0 : index
    %c0_4 = arith.constant 0 : index
    %2 = vector.load %arg4[%c0_3, %c0_4] : memref<3x128xf32, #tpu.memory_space<vmem>>, vector<3x128xf32>
    %3 = vector.extract_strided_slice %0 {offsets = [0, 0], sizes = [4, 1], strides = [1, 1]} : vector<4x3xf32> to vector<4x1xf32>
    %4 = vector.extract_strided_slice %1 {offsets = [0, 0], sizes = [1, 128], strides = [1, 1]} : vector<3x128xf32> to vector<1x128xf32>
    %5 = vector.broadcast %3 : vector<4x1xf32> to vector<4x128xf32>
    %6 = vector.broadcast %4 : vector<1x128xf32> to vector<4x128xf32>
    %7 = arith.mulf %5, %6 : vector<4x128xf32>
    %8 = vector.extract_strided_slice %2 {offsets = [0, 0], sizes = [1, 128], strides = [1, 1]} : vector<3x128xf32> to vector<1x128xf32>
    %9 = vector.broadcast %8 : vector<1x128xf32> to vector<4x128xf32>
    %10 = arith.addf %7, %9 : vector<4x128xf32>
    %c0_5 = arith.constant 0 : index
    %c0_6 = arith.constant 0 : index
    %11 = vector.load %arg7[%c0_5, %c0_6] : memref<4x640xf32, #tpu.memory_space<vmem>>, vector<4x128xf32>
    tpu.vector_store %arg7[%c0_5, %c0_6], %10 {strides = array<i32>} : memref<4x640xf32, #tpu.memory_space<vmem>>, vector<4x128xf32>,
    %12 = vector.extract_strided_slice %0 {offsets = [0, 1], sizes = [4, 1], strides = [1, 1]} : vector<4x3xf32> to vector<4x1xf32>
    %13 = vector.extract_strided_slice %1 {offsets = [1, 0], sizes = [1, 128], strides = [1, 1]} : vector<3x128xf32> to vector<1x128xf32>
    %14 = vector.broadcast %12 : vector<4x1xf32> to vector<4x128xf32>
    %15 = vector.broadcast %13 : vector<1x128xf32> to vector<4x128xf32>
    %16 = arith.mulf %14, %15 : vector<4x128xf32>
    %17 = vector.extract_strided_slice %2 {offsets = [1, 0], sizes = [1, 128], strides = [1, 1]} : vector<3x128xf32> to vector<1x128xf32>
    %18 = vector.broadcast %17 : vector<1x128xf32> to vector<4x128xf32>
    %19 = arith.addf %16, %18 : vector<4x128xf32>
    %c0_7 = arith.constant 0 : index
    %c128 = arith.constant 128 : index
    %20 = vector.load %arg7[%c0_7, %c128] : memref<4x640xf32, #tpu.memory_space<vmem>>, vector<4x128xf32>
    tpu.vector_store %arg7[%c0_7, %c128], %19 {strides = array<i32>} : memref<4x640xf32, #tpu.memory_space<vmem>>, vector<4x128xf32>,
    %21 = vector.extract_strided_slice %0 {offsets = [0, 2], sizes = [4, 1], strides = [1, 1]} : vector<4x3xf32> to vector<4x1xf32>
    %22 = vector.extract_strided_slice %1 {offsets = [2, 0], sizes = [1, 128], strides = [1, 1]} : vector<3x128xf32> to vector<1x128xf32>
    %23 = vector.broadcast %21 : vector<4x1xf32> to vector<4x128xf32>
    %24 = vector.broadcast %22 : vector<1x128xf32> to vector<4x128xf32>
    %25 = arith.mulf %23, %24 : vector<4x128xf32>
    %26 = vector.extract_strided_slice %2 {offsets = [2, 0], sizes = [1, 128], strides = [1, 1]} : vector<3x128xf32> to vector<1x128xf32>
    %27 = vector.broadcast %26 : vector<1x128xf32> to vector<4x128xf32>
    %28 = arith.addf %25, %27 : vector<4x128xf32>
    %c0_8 = arith.constant 0 : index
    %c256 = arith.constant 256 : index
    %29 = vector.load %arg7[%c0_8, %c256] : memref<4x640xf32, #tpu.memory_space<vmem>>, vector<4x128xf32>
    tpu.vector_store %arg7[%c0_8, %c256], %28 {strides = array<i32>} : memref<4x640xf32, #tpu.memory_space<vmem>>, vector<4x128xf32>,
    %c0_9 = arith.constant 0 : index
    %c0_10 = arith.constant 0 : index
    %30 = vector.load %arg2[%c0_9, %c0_10] : memref<4x2xi32, #tpu.memory_space<vmem>>, vector<4x2xi32>
    %c0_i32 = arith.constant 0 : i32
    %c4_i32 = arith.constant 4 : i32
    %31 = vector.broadcast %c0_i32 : i32 to vector<4x2xi32>
    %32 = arith.maxsi %31, %30 : vector<4x2xi32>
    %33 = vector.broadcast %c4_i32 : i32 to vector<4x2xi32>
    %34 = arith.minsi %33, %32 : vector<4x2xi32>
    %c0_11 = arith.constant 0 : index
    %c0_12 = arith.constant 0 : index
    %35 = vector.load %arg5[%c0_11, %c0_12] : memref<5x128xf32, #tpu.memory_space<vmem>>, vector<5x128xf32>
    %c0_13 = arith.constant 0 : index
    %c0_14 = arith.constant 0 : index
    %36 = vector.load %arg6[%c0_13, %c0_14] : memref<2x128xf32, #tpu.memory_space<vmem>>, vector<2x128xf32>
    %37 = tpu.iota {dimensions = array<i32: 1>} : vector<4x5xi32>
    %38 = vector.extract_strided_slice %34 {offsets = [0, 0], sizes = [4, 1], strides = [1, 1]} : vector<4x2xi32> to vector<4x1xi32>
    %39 = vector.broadcast %38 : vector<4x1xi32> to vector<4x5xi32>
    %40 = arith.cmpi eq, %39, %37 : vector<4x5xi32>
    %41 = arith.extui %40 : vector<4x5xi1> to vector<4x5xi32>
    %42 = arith.sitofp %41 : vector<4x5xi32> to vector<4x5xf32>
    %cst = arith.constant dense<0.000000e+00> : vector<4x128xf32>
    %43 = tpu.matmul %42, %35, %cst {dimension_numbers = #tpu.dot_dimension_numbers<[1], [0], [0], [1], [0, 0, 1, 1], [], []>} : vector<4x5xf32>, vector<5x128xf32>, vector<4x128xf32> -> vector<4x128xf32>
    %44 = vector.extract_strided_slice %36 {offsets = [0, 0], sizes = [1, 128], strides = [1, 1]} : vector<2x128xf32> to vector<1x128xf32>
    %45 = vector.broadcast %44 : vector<1x128xf32> to vector<4x128xf32>
    %46 = arith.addf %43, %45 : vector<4x128xf32>
    %c0_15 = arith.constant 0 : index
    %c384 = arith.constant 384 : index
    %47 = vector.load %arg7[%c0_15, %c384] : memref<4x640xf32, #tpu.memory_space<vmem>>, vector<4x128xf32>
    tpu.vector_store %arg7[%c0_15, %c384], %46 {strides = array<i32>} : memref<4x640xf32, #tpu.memory_space<vmem>>, vector<4x128xf32>,
    %48 = vector.extract_strided_slice %34 {offsets = [0, 1], sizes = [4, 1], strides = [1, 1]} : vector<4x2xi32> to vector<4x1xi32>
    %49 = vector.broadcast %48 : vector<4x1xi32> to vector<4x5xi32>
    %50 = arith.cmpi eq, %49, %37 : vector<4x5xi32>
    %51 = arith.extui %50 : vector<4x5xi1> to vector<4x5xi32>
    %52 = arith.sitofp %51 : vector<4x5xi32> to vector<4x5xf32>
    %cst_16 = arith.constant dense<0.000000e+00> : vector<4x128xf32>
    %53 = tpu.matmul %52, %35, %cst_16 {dimension_numbers = #tpu.dot_dimension_numbers<[1], [0], [0], [1], [0, 0, 1, 1], [], []>} : vector<4x5xf32>, vector<5x128xf32>, vector<4x128xf32> -> vector<4x128xf32>
    %54 = vector.extract_strided_slice %36 {offsets = [1, 0], sizes = [1, 128], strides = [1, 1]} : vector<2x128xf32> to vector<1x128xf32>
    %55 = vector.broadcast %54 : vector<1x128xf32> to vector<4x128xf32>
    %56 = arith.addf %53, %55 : vector<4x128xf32>
    %c0_17 = arith.constant 0 : index
    %c512 = arith.constant 512 : index
    %57 = vector.load %arg7[%c0_17, %c512] : memref<4x640xf32, #tpu.memory_space<vmem>>, vector<4x128xf32>
    tpu.vector_store %arg7[%c0_17, %c512], %56 {strides = array<i32>} : memref<4x640xf32, #tpu.memory_space<vmem>>, vector<4x128xf32>,
    return
  }
  func.func @transform_0(%arg0: i32) -> (i32, i32) {
    %c0_i32 = arith.constant 0 : i32
    %c0_i32_0 = arith.constant 0 : i32
    return %arg0, %c0_i32 : i32, i32
  }
  func.func @transform_1(%arg0: i32) -> (i32, i32) {
    %c0_i32 = arith.constant 0 : i32
    %c0_i32_0 = arith.constant 0 : i32
    return %arg0, %c0_i32 : i32, i32
  }
  func.func @transform_2(%arg0: i32) -> (i32, i32) {
    %c0_i32 = arith.constant 0 : i32
    %c0_i32_0 = arith.constant 0 : i32
    %c0_i32_1 = arith.constant 0 : i32
    return %c0_i32, %c0_i32_0 : i32, i32
  }
  func.func @transform_3(%arg0: i32) -> (i32, i32) {
    %c0_i32 = arith.constant 0 : i32
    %c0_i32_0 = arith.constant 0 : i32
    %c0_i32_1 = arith.constant 0 : i32
    return %c0_i32, %c0_i32_0 : i32, i32
  }
  func.func @transform_4(%arg0: i32) -> (i32, i32) {
    %c0_i32 = arith.constant 0 : i32
    %c0_i32_0 = arith.constant 0 : i32
    %c0_i32_1 = arith.constant 0 : i32
    return %c0_i32, %c0_i32_0 : i32, i32
  }
  func.func @transform_5(%arg0: i32) -> (i32, i32) {
    %c0_i32 = arith.constant 0 : i32
    %c0_i32_0 = arith.constant 0 : i32
    %c0_i32_1 = arith.constant 0 : i32
    return %c0_i32, %c0_i32_0 : i32, i32
  }
  func.func @transform_6(%arg0: i32) -> (i32, i32) {
    %c0_i32 = arith.constant 0 : i32
    %c0_i32_0 = arith.constant 0 : i32
    return %arg0, %c0_i32 : i32, i32
  }
}

</mosaic_0001>

<bundles_post_ra>
// kernel: tpu_custom_call.1
= control target key start
LH: loop header
LB: loop body
LE: loop exit
PB: predicated region body
PF: predicated region fallthrough
CT: control target
= control target key end

     0   :  { %11 = vsyncpa [#allocation3], 0  ;;  %s375_s0 = inlined_call_operand.hbm [shape: f32[4,3], index: 0, kind: input, shape index: {}]   ;;  %s376_s1 = inlined_call_operand.vmem [shape: s32[4,2], index: 1, kind: input, shape index: {}]   ;;  %s377_s2 = inlined_call_operand.hbm [shape: f32[3,128], index: 2, kind: input, shape index: {}]   ;;  %s378_s3 = inlined_call_operand.hbm [shape: f32[3,128], index: 3, kind: input, shape index: {}]   ;;  %s379_s4 = inlined_call_operand.vmem [shape: f32[5,128], index: 4, kind: input, shape index: {}]   ;;  %s380_s5 = inlined_call_operand.vmem [shape: f32[2,128], index: 5, kind: input, shape index: {}]   ;;  %s381_s6 = inlined_call_operand.hbm [shape: f32[4,640], index: 6, kind: output, shape index: {}]  }
   0x1   :  { %12 = vsyncpa [#allocation6], 0  ;;  %s32_s23 = sshll.u32 %s377_s2, 4  ;;  %s33_s23 = int_to_ptr.hbm [resolvable:$true] %s32_s23 }
   0x2   :  { %13 = vsyncpa [#allocation4], 0  ;;  %s311_s24 = smov [#allocation5]   ;;  %s19_s28 = sshll.u32 %s375_s0, 4  ;;  %s20_s28 = int_to_ptr.hbm [resolvable:$true] %s19_s28 }
   0x3   :  { %s34_s25 = sshll.u32 %s311_s24, 4  ;;  %s312_s29 = smov [#allocation2]   ;;  %s35_s25 = int_to_ptr.vmem [resolvable:$true] %s34_s25 }
   0x4   :  { %37 = dma.hbm_to_vmem [thread:$0]  %s33_s23, 64, %s35_s25, [#allocation6]  }
   0x5   :  { %s21_s30 = sshll.u32 %s312_s29, 4  ;;  %s43_s9 = sshll.u32 %s378_s3, 4  ;;  %s22_s30 = int_to_ptr.vmem [resolvable:$true] %s21_s30  ;;  %s44_s9 = int_to_ptr.hbm [resolvable:$true] %s43_s9 }
   0x6   :  { %24 = dma.hbm_to_vmem [thread:$0]  %s20_s28, 64, %s22_s30, [#allocation3]  }
   0x7   :  { %s313_s2 = smov [#allocation7]  }
   0x8   :  { %s45_s10 = sshll.u32 %s313_s2, 4  ;;  %s46_s10 = int_to_ptr.vmem [resolvable:$true] %s45_s10 }
   0x9   :  { %48 = dma.hbm_to_vmem [thread:$0]  %s44_s9, 64, %s46_s10, [#allocation6]  }
   0xa   :  { %305 = dma.done.wait [#allocation3], 64  }
   0xb   :  { %306 = vsyncadd [#allocation3], 4294967232 }
   0xc   :  { %307 = dma.done.wait [#allocation6], 128  }
   0xd   :  { %308 = vsyncadd [#allocation6], 4294967168  ;;  %v314_v0 = vmov 0   ;;  %v96_v1 = vld [vmem:[%s376_s1] sm:$0xf]  ;;  %v315_v4 = vmov 1   ;;  %v103_v8 = vlaneseq }
   0xe   :  { %204 = vset.pattern.permute.xlu0 %v314_v0  ;;  %206 = vset.pattern.permute.xlu1 %v314_v0  ;;  %vm97_vm0 = vcmp.gt.s32.totalorder %v96_v1, 0  ;;  %v101_v5 = vld [vmem:[%s379_s4] sm:$0x1f]  ;;  %vm116_vm2 = vcmask 1044480   ;;  %v316_v7 = vmov 2   ;;  %vm112_vm3 = vcmask 39936  }
   0xf   :  { %v98_v2 = vsel %vm97_vm0, %v96_v1, 0  ;;  %191 = vmatpush.msk.msra.mxu0 %vm116_vm2, %v101_v5  ;;  %194 = vmatpush.msk.msra.mxu1 %vm116_vm2, %v101_v5  ;;  %v65_v6 = vld [vmem:[#allocation2] sm:$0xf]  ;;  %v104_v9 = vand.u32 127, %v103_v8  ;;  %v317_v11 = vmov 0.0   ;;  %s318_s13 = smov [#allocation8]  }
  0x10   :  { %vm99_vm1 = vcmp.lt.s32.totalorder %v98_v2, 4  ;;  %70 = vperm.xlu1 %206, %v65_v6   ;;  %208 = vset.pattern.permute.xlu2 %v316_v7  ;;  %v66_v15 = vld [vmem:[#allocation5] sm:$0x7]  ;;  %v67_v16 = vld [vmem:[#allocation7] sm:$0x7]  ;;  %s177_s14 = sshll.u32 %s318_s13, 4  ;;  %s178_s14 = int_to_ptr.vmem [resolvable:$true] %s177_s14 }
  0x11   :  { %v100_v3 = vsel %vm99_vm1, %v98_v2, 4  ;;  %88 = vperm.xlu2 %208, %v65_v6   ;;  %v73_v17 = vperm.slane %v66_v15, 0  ;;  %v75_v18 = vperm.slane %v67_v16, 0  ;;  %v91_v22 = vperm.slane %v66_v15, 2  ;;  %v102_v32 = vld [vmem:[%s380_s5] sm:$0x3] }
  0x12   :  { %106 = vperm.xlu0 %204, %v100_v3   ;;  %v93_v23 = vperm.slane %v67_v16, 2  ;;  %v82_v25 = vperm.slane %v66_v15, 1  ;;  %v84_v27 = vperm.slane %v67_v16, 1  ;;  %v111_v33 = vperm.slane %v102_v32, 0  ;;  %s179_s17 = sshll.u32 %s381_s6, 4  ;;  %s180_s17 = int_to_ptr.hbm [resolvable:$true] %s179_s17 }
  0x13   :  { %v147_v36 = vperm.slane %v102_v32, 1 }
  0x18   :  { %207 = vset.pattern.permute.xlu1 %v315_v4 }
  0x19   :  { %79 = vperm.xlu1 %207, %v65_v6  }
  0x1a   :  { %205 = vset.pattern.permute.xlu0 %v315_v4 }
  0x1b   :  { %142 = vperm.xlu0 %205, %v100_v3  }
  0x6b   :  { %v89_v24 = vpop.permute.xlu2 %88 }
  0x6c   :  { %v92_v26 = vmul.f32 %v91_v22, %v89_v24 }
  0x6e   :  { %v94_v28 = vadd.f32 %v93_v23, %v92_v26 }
  0x70   :  { %95 = vst [vmem:[#allocation8 + $0x8] sm:$0xf] %v94_v28 }
  0x82   :  { %v71_v19 = vpop.permute.xlu1 %70 }
  0x83   :  { %v74_v20 = vmul.f32 %v73_v17, %v71_v19 }
  0x84   :  { %v107_v10 = vpop.permute.xlu0 %106 }
  0x85   :  { %vm108_vm4 = vcmp.eq.s32.totalorder %v107_v10, %v104_v9  ;;  %v76_v21 = vadd.f32 %v75_v18, %v74_v20 }
  0x86   :  { %v190_v12 = vsel %vm108_vm4, 1.0, %v317_v11 }
  0x87   :  { %192 = vmatmul.msk.f32.vlgmr.msra.gmra.mxu0 %vm112_vm3, %v190_v12  ;;  %77 = vst [vmem:[#allocation8] sm:$0xf] %v76_v21 }
  0x8b   :  { %v80_v29 = vpop.permute.xlu1 %79 }
  0x8c   :  { %v83_v30 = vmul.f32 %v82_v25, %v80_v29 }
  0x8d   :  { %v143_v13 = vpop.permute.xlu0 %142 }
  0x8e   :  { %vm144_vm5 = vcmp.eq.s32.totalorder %v143_v13, %v104_v9  ;;  %v85_v31 = vadd.f32 %v84_v27, %v83_v30 }
  0x8f   :  { %v193_v14 = vsel %vm144_vm5, 1.0, %v317_v11 }
  0x90   :  { %195 = vmatmul.msk.f32.vlgmr.msra.gmra.mxu1 %vm112_vm3, %v193_v14  ;;  %86 = vst [vmem:[#allocation8 + $0x4] sm:$0xf] %v85_v31 }
 0x104   :  { %v137_v34 = vpop.f32.mrf.mxu0 }
 0x105   :  { %v138_v35 = vadd.f32 %v137_v34, %v111_v33 }
 0x107   :  { %140 = vst [vmem:[#allocation8 + $0xc] sm:$0xf] %v138_v35 }
 0x10d   :  { %v168_v37 = vpop.f32.mrf.mxu1 }
 0x10e   :  { %v169_v38 = vadd.f32 %v168_v37, %v147_v36 }
 0x110   :  { %171 = vst [vmem:[#allocation8 + $0x10] sm:$0xf] %v169_v38 }
 0x111   :  { %182 = dma.vmem_to_hbm [thread:$0]  %s178_s14, 320, %s180_s17, [#allocation4]  }
 0x112   :  { %309 = dma.done.wait [#allocation4], 320  }
 0x113   :  { %310 = vsyncadd [#allocation4], 4294966976 }
 0x114   :  { %187 = vsyncpa [#allocation3], 1 }
 0x115   :  { %188 = vsyncpa [#allocation6], 1 }
 0x116   :  { %189 = vsyncpa [#allocation4], 1 }

</bundles_post_ra>
